<compile_context>
chip_gen: v5e
topology: v5e:2x2
jax: 0.10.0
libtpu: 0.0.40
codegen_flags: <defaults>
</compile_context>

<pallas_src>
import functools

import jax
import jax.numpy as jnp
import numpy as np
from jax.experimental import pallas as pl
from jax.experimental.pallas import tpu as pltpu


# --------------------------------------------------------------------------- #
# Pallas kernel: field lerp/addmul/normalize + second-order combine for one
# (hw-tile, batch-block) grid cell.
# --------------------------------------------------------------------------- #
def _wl2d_field_kernel(coef_ref, wf_ref, o_ref, *, eps, tb):
    """coef_ref: (TB, 12, 20, 1) f32   rows = m*4 + cc*2 + j
       wf_ref:   (8, 20, T)      bf16  rows = i*4 + c*2 + j (pair i, re/im c)
       o_ref:    (TB, 1, T)            output tile."""
    f32 = jnp.float32

    def wplane(i, c, j):
        return wf_ref[i * 4 + c * 2 + j].astype(f32)          # (20, T)

    # Field terms shared by every batch row in this block (cast + diff once).
    shared = []
    for j in (0, 1):
        w0_re, w0_im = wplane(0, 0, j), wplane(0, 1, j)
        w1_re, w1_im = wplane(1, 0, j), wplane(1, 1, j)
        shared.append((w0_re, w0_im, w1_re - w0_re, w1_im - w0_im))

    def body(b, carry):
        cf = coef_ref[b].astype(f32)                          # (12, 20, 1)

        def coef(m, cc, j):
            return cf[m * 4 + cc * 2 + j]                     # (20, 1)

        d = []
        for j in (0, 1):
            w0_re, w0_im, dw_re, dw_im = shared[j]
            l_re, l_im = coef(0, 0, j), coef(0, 1, j)
            b_re, b_im = coef(1, 0, j), coef(1, 1, j)
            s_re, s_im = coef(2, 0, j), coef(2, 1, j)
            # complex lerp(w0, w1, l)  (written as w0 + l*(w1-w0))
            c_re = w0_re + l_re * dw_re - l_im * dw_im
            c_im = w0_im + l_re * dw_im + l_im * dw_re
            # complex addmul(c, s, b) = c*s + b
            d_re = b_re + c_re * s_re - c_im * s_im
            d_im = b_im + c_re * s_im + c_im * s_re
            d.append((d_re, d_im))
        (d0_re, d0_im), (d1_re, d1_im) = d

        # normalize by the j=0 half, project the j=1 half onto it.
        inv = jax.lax.rsqrt(d0_re * d0_re + d0_im * d0_im + eps)
        comp = (d1_re * d0_re + d1_im * d0_im) * inv          # (20, T)

        # Second order: value v has re = comp[v], im = comp[v+10]; groups of
        # 2 rows (slot dim).  These 2-row slices are sublane-misaligned but
        # operate on 1/10 of the data of the first-order region above.
        A_re, A_im = comp[0:2], comp[10:12]
        B_re, B_im = comp[2:4], comp[12:14]
        L_re, L_im = comp[4:6] + 0.5, comp[14:16]     # shift_lerp  = (0.5, 0)
        P_re, P_im = comp[6:8], comp[16:18]
        S_re, S_im = comp[8:10] + 1.0, comp[18:20]    # shift_scale = (1.0, 0)
        dab_re = B_re - A_re
        dab_im = B_im - A_im
        q_re = A_re + L_re * dab_re - L_im * dab_im
        q_im = A_im + L_re * dab_im + L_im * dab_re
        r_re = P_re + q_re * S_re - q_im * S_im
        r_im = P_im + q_re * S_im + q_im * S_re               # (2, T)

        r0_re, r1_re = r_re[0:1], r_re[1:2]
        r0_im, r1_im = r_im[0:1], r_im[1:2]
        inv2 = jax.lax.rsqrt(r0_re * r0_re + r0_im * r0_im + eps)
        out = (r1_re * r0_re + r1_im * r0_im) * inv2          # (1, T)
        o_ref[b] = out.astype(o_ref.dtype)
        return carry

    jax.lax.fori_loop(0, tb, body, 0)


# --------------------------------------------------------------------------- #
# Parameter init (deterministic, mirrors the module's __init__ shapes)
# --------------------------------------------------------------------------- #
def init_params(key, output_shape, context_length,
                initialization_std=0.01, dtype_weights=jnp.bfloat16):
    H, W = output_shape
    k1, k2, k3 = jax.random.split(key, 3)
    bound = 1.0 / np.sqrt(context_length)
    lin_w = jax.random.uniform(k1, (480, context_length), jnp.float32,
                               -bound, bound).astype(dtype_weights)
    lin_b = jax.random.uniform(k2, (480,), jnp.float32,
                               -bound, bound).astype(dtype_weights)
    weights = (initialization_std *
               jax.random.normal(k3, (1, 2, 2, 20, H, W, 2), jnp.float32)
               ).astype(dtype_weights)
    return {"lin_w": lin_w, "lin_b": lin_b, "weights": weights}


# --------------------------------------------------------------------------- #
# Wrapper: context transform + gating (XLA), layout repack, pallas_call.
# --------------------------------------------------------------------------- #
def weights_lib_2d_forward(params, x, output_shape, eps=1e-12,
                           dtype_weights=jnp.bfloat16,
                           hw_tile_cap=4096, batch_block=4):
    H, W = output_shape
    HW = H * W
    B, C = x.shape
    input_dtype = x.dtype
    f32 = jnp.float32

    # ---- Linear(C->480) + tanh gating: tiny, lane-dense, done in XLA -------
    xk = x.astype(dtype_weights).astype(f32)               # torch: x.to(bf16)
    lw = params["lin_w"].astype(f32)                       # (480, C)
    lb = params["lin_b"].astype(f32)                       # (480,)
    t = xk @ lw.T + lb                                     # (B, 480)
    mod = t[:, 0:240] * jnp.tanh(t[:, 240:480]) * 2.0      # (B, 240)

    # (B,240) -> (B, m, j, k, cc) -> (B, m, cc, j, k) -> (B, 12, 20, 1)
    coef = mod.reshape(B, 3, 2, 20, 2).transpose(0, 1, 4, 2, 3)
    shift = np.zeros((1, 3, 2, 1, 1), np.float32)
    shift[0, 0, 0] = 0.5          # shift_lerp  = (0.5, 0) on m=0, re
    shift[0, 2, 0] = 1.0          # shift_scale = (1.0, 0) on m=2, re
    coef = (coef + jnp.asarray(shift)).reshape(B, 12, 20, 1)

    # ---- repack library weights (1,2,2,20,H,W,2) -> (i*4+c*2+j, 20, HW) ----
    wf = jnp.transpose(params["weights"][0], (0, 5, 1, 2, 3, 4))  # (i,c,j,k,H,W)
    wf = wf.reshape(8, 20, HW)

    # ---- tiling / padding (lane-dense, multiples of 128) -------------------
    hw128 = ((HW + 127) // 128) * 128
    t_hw = min(int(hw_tile_cap), hw128)
    hw_pad = ((HW + t_hw - 1) // t_hw) * t_hw
    if hw_pad != HW:
        wf = jnp.pad(wf, ((0, 0), (0, 0), (0, hw_pad - HW)))

    tb = min(int(batch_block), B)
    b_pad = ((B + tb - 1) // tb) * tb
    if b_pad != B:
        coef = jnp.pad(coef, ((0, b_pad - B), (0, 0), (0, 0), (0, 0)))

    n_hw = hw_pad // t_hw
    n_b = b_pad // tb

    kernel = functools.partial(_wl2d_field_kernel, eps=float(eps), tb=tb)
    out = pl.pallas_call(
        kernel,
        out_shape=jax.ShapeDtypeStruct((b_pad, 1, hw_pad), input_dtype),
        grid_spec=pltpu.PrefetchScalarGridSpec(
            num_scalar_prefetch=0,
            # hw outer / batch inner: the field tile is reused across the
            # consecutive batch blocks instead of being re-streamed from HBM.
            grid=(n_hw, n_b),
            in_specs=[
                pl.BlockSpec((tb, 12, 20, 1), lambda hw, bb: (bb, 0, 0, 0)),
                pl.BlockSpec((8, 20, t_hw), lambda hw, bb: (0, 0, hw)),
            ],
            out_specs=pl.BlockSpec((tb, 1, t_hw), lambda hw, bb: (bb, 0, hw)),
        ),
        compiler_params=pltpu.CompilerParams(
            dimension_semantics=("parallel", "parallel"),
            vmem_limit_bytes=48 * 1024 * 1024,   # headroom under v7x's 64 MiB
        ),
    )(coef, wf)

    return out[:B, 0, :HW].reshape(B, H, W)


# --------------------------------------------------------------------------- #
# Pure-JAX reference (mirrors the torch code, f32 math on bf16 params)
# --------------------------------------------------------------------------- #
def _reference(params, x, output_shape, eps=1e-12, dtype_weights=jnp.bfloat16):
    H, W = output_shape
    B = x.shape[0]
    f32 = jnp.float32

    def lerp(z1, z2, cc):
        return jnp.stack(
            [(1 - cc[..., 0]) * z1[..., 0] + cc[..., 0] * z2[..., 0]
             - cc[..., 1] * (z2[..., 1] - z1[..., 1]),
             (1 - cc[..., 0]) * z1[..., 1] + cc[..., 0] * z2[..., 1]
             + cc[..., 1] * (z2[..., 0] - z1[..., 0])], axis=-1)

    def addmul(z1, z2, bb):
        return jnp.stack(
            [bb[..., 0] + z1[..., 0] * z2[..., 0] - z1[..., 1] * z2[..., 1],
             bb[..., 1] + z1[..., 0] * z2[..., 1] + z1[..., 1] * z2[..., 0]],
            axis=-1)

    xb = x.astype(dtype_weights).astype(f32)
    lw = params["lin_w"].astype(f32)
    lb = params["lin_b"].astype(f32)
    xt = xb @ lw.T + lb
    mod = xt[:, 0:240] * jnp.tanh(xt[:, 240:]) * 2.0
    mod = jnp.broadcast_to(mod.reshape(B, 3, 2, 20, 1, 1, 2),
                           (B, 3, 2, 20, H, W, 2))
    shift_l = jnp.array([0.5, 0.0], f32).reshape(1, 1, 1, 2)
    shift_s = jnp.array([1.0, 0.0], f32).reshape(1, 1, 1, 2)
    param_l = mod[:, 0] + shift_l
    param_b = mod[:, 1]
    param_s = mod[:, 2] + shift_s

    comp = jnp.broadcast_to(params["weights"].astype(f32),
                            (B, 2, 2, 20, H, W, 2))
    comp = lerp(comp[:, 0], comp[:, 1], param_l)
    comp = addmul(comp, param_s, param_b)
    denom = jnp.sqrt((comp[:, 0] ** 2).sum(-1) + eps)[..., None]
    theta = comp[:, 0] / denom
    comp = (comp[:, 1] * theta).sum(-1)                         # (B,20,H,W)
    comp = jnp.stack([comp[:, 0:10], comp[:, 10:]], axis=-1)    # (B,10,H,W,2)

    so_a = comp[:, 0:2]
    so_b = comp[:, 2:4]
    so_l = comp[:, 4:6] + shift_l[None]
    so_bias = comp[:, 6:8]
    so_s = comp[:, 8:] + shift_s[None]
    so = lerp(so_a, so_b, so_l)
    so = addmul(so, so_s, so_bias)
    so_denom = jnp.sqrt((so[:, 0] ** 2).sum(-1) + eps)[..., None]
    so_theta = so[:, 0] / so_denom
    out = (so[:, 1] * so_theta).sum(-1)
    return out.astype(x.dtype)


# --------------------------------------------------------------------------- #
def _check_case(key, output_shape, context_length, batch):
    pkey, xkey = jax.random.split(key)
    params = init_params(pkey, output_shape, context_length)
    x = jax.random.normal(xkey, (batch, context_length), jnp.float32)

    out = weights_lib_2d_forward(params, x, output_shape, eps=1e-12)
    out = jax.block_until_ready(out)

    assert out.shape == (batch, *output_shape)
    assert out.dtype == x.dtype

    ref = _reference(params, x, output_shape, eps=1e-12)
    rel = float(jnp.max(jnp.abs(out - ref) / (1.0 + jnp.abs(ref))))
    if not np.isfinite(rel) or rel > 3e-2:
        raise AssertionError(
            f"kernel/reference mismatch for shape={output_shape}, "
            f"batch={batch}: rel err = {rel}")


if __name__ == "__main__":
    key = jax.random.PRNGKey(0)
    k1, k2 = jax.random.split(key)

    # Case 1: lane-aligned H*W (16*16 = 256), batch fits one block.
    _check_case(k1, output_shape=(16, 16), context_length=8, batch=2)

    # Case 2: ragged H*W (10*30 = 300 -> padded to 384) and a batch that is
    # not a multiple of the batch block (5 -> padded to 8); exercises the
    # padding / tiling paths.
    _check_case(k2, output_shape=(10, 30), context_length=8, batch=5)

    print("KERNEL_OK")
</pallas_src>

<mosaic_0001>
module attributes {stable_mosaic.version = 11 : i64} {
  func.func @_wl2d_field_kernel(%arg0: i32, %arg1: i32, %arg2: memref<2x12x20x1xf32, #tpu.memory_space<vmem>>, %arg3: memref<8x20x256xbf16, #tpu.memory_space<vmem>>, %arg4: memref<2x1x256xf32, #tpu.memory_space<vmem>>) attributes {dimension_semantics = [#tpu.dimension_semantics<parallel>, #tpu.dimension_semantics<parallel>], iteration_bounds = array<i64: 1, 1>, scalar_prefetch = 0 : i64, scratch_operands = 0 : i64, tpu.core_type = #tpu.core_type<tc>, window_params = [{transform_indices = @transform_0, window_bounds = array<i64: 2, 12, 20, 1>}, {transform_indices = @transform_1, window_bounds = array<i64: 8, 20, 256>}, {transform_indices = @transform_2, window_bounds = array<i64: 2, 1, 256>}]} {
    %c0 = arith.constant 0 : index
    %c0_0 = arith.constant 0 : index
    %c0_1 = arith.constant 0 : index
    %0 = vector.load %arg3[%c0, %c0_0, %c0_1] : memref<8x20x256xbf16, #tpu.memory_space<vmem>>, vector<1x20x256xbf16>
    %1 = vector.shape_cast %0 : vector<1x20x256xbf16> to vector<20x256xbf16>
    %2 = arith.extf %1 : vector<20x256xbf16> to vector<20x256xf32>
    %c2 = arith.constant 2 : index
    %c0_2 = arith.constant 0 : index
    %c0_3 = arith.constant 0 : index
    %3 = vector.load %arg3[%c2, %c0_2, %c0_3] : memref<8x20x256xbf16, #tpu.memory_space<vmem>>, vector<1x20x256xbf16>
    %4 = vector.shape_cast %3 : vector<1x20x256xbf16> to vector<20x256xbf16>
    %5 = arith.extf %4 : vector<20x256xbf16> to vector<20x256xf32>
    %c4 = arith.constant 4 : index
    %c0_4 = arith.constant 0 : index
    %c0_5 = arith.constant 0 : index
    %6 = vector.load %arg3[%c4, %c0_4, %c0_5] : memref<8x20x256xbf16, #tpu.memory_space<vmem>>, vector<1x20x256xbf16>
    %7 = vector.shape_cast %6 : vector<1x20x256xbf16> to vector<20x256xbf16>
    %8 = arith.extf %7 : vector<20x256xbf16> to vector<20x256xf32>
    %c6 = arith.constant 6 : index
    %c0_6 = arith.constant 0 : index
    %c0_7 = arith.constant 0 : index
    %9 = vector.load %arg3[%c6, %c0_6, %c0_7] : memref<8x20x256xbf16, #tpu.memory_space<vmem>>, vector<1x20x256xbf16>
    %10 = vector.shape_cast %9 : vector<1x20x256xbf16> to vector<20x256xbf16>
    %11 = arith.extf %10 : vector<20x256xbf16> to vector<20x256xf32>
    %12 = arith.subf %8, %2 : vector<20x256xf32>
    %13 = arith.subf %11, %5 : vector<20x256xf32>
    %c1 = arith.constant 1 : index
    %c0_8 = arith.constant 0 : index
    %c0_9 = arith.constant 0 : index
    %14 = vector.load %arg3[%c1, %c0_8, %c0_9] : memref<8x20x256xbf16, #tpu.memory_space<vmem>>, vector<1x20x256xbf16>
    %15 = vector.shape_cast %14 : vector<1x20x256xbf16> to vector<20x256xbf16>
    %16 = arith.extf %15 : vector<20x256xbf16> to vector<20x256xf32>
    %c3 = arith.constant 3 : index
    %c0_10 = arith.constant 0 : index
    %c0_11 = arith.constant 0 : index
    %17 = vector.load %arg3[%c3, %c0_10, %c0_11] : memref<8x20x256xbf16, #tpu.memory_space<vmem>>, vector<1x20x256xbf16>
    %18 = vector.shape_cast %17 : vector<1x20x256xbf16> to vector<20x256xbf16>
    %19 = arith.extf %18 : vector<20x256xbf16> to vector<20x256xf32>
    %c5 = arith.constant 5 : index
    %c0_12 = arith.constant 0 : index
    %c0_13 = arith.constant 0 : index
    %20 = vector.load %arg3[%c5, %c0_12, %c0_13] : memref<8x20x256xbf16, #tpu.memory_space<vmem>>, vector<1x20x256xbf16>
    %21 = vector.shape_cast %20 : vector<1x20x256xbf16> to vector<20x256xbf16>
    %22 = arith.extf %21 : vector<20x256xbf16> to vector<20x256xf32>
    %c7 = arith.constant 7 : index
    %c0_14 = arith.constant 0 : index
    %c0_15 = arith.constant 0 : index
    %23 = vector.load %arg3[%c7, %c0_14, %c0_15] : memref<8x20x256xbf16, #tpu.memory_space<vmem>>, vector<1x20x256xbf16>
    %24 = vector.shape_cast %23 : vector<1x20x256xbf16> to vector<20x256xbf16>
    %25 = arith.extf %24 : vector<20x256xbf16> to vector<20x256xf32>
    %26 = arith.subf %22, %16 : vector<20x256xf32>
    %27 = arith.subf %25, %19 : vector<20x256xf32>
    %c0_i32 = arith.constant 0 : i32
    %c2_i32 = arith.constant 2 : i32
    %28 = arith.addi %c0_i32, %c2_i32 : i32
    %c1_i32 = arith.constant 1 : i32
    scf.for %arg5 = %c0_i32 to %28 step %c1_i32  : i32 {
      %29 = arith.index_cast %arg5 : i32 to index
      %c0_17 = arith.constant 0 : index
      %c0_18 = arith.constant 0 : index
      %c0_19 = arith.constant 0 : index
      %30 = vector.load %arg2[%29, %c0_17, %c0_18, %c0_19] : memref<2x12x20x1xf32, #tpu.memory_space<vmem>>, vector<1x12x20x1xf32>
      %31 = vector.shape_cast %30 : vector<1x12x20x1xf32> to vector<12x20x1xf32>
      %32 = vector.extract_strided_slice %31 {offsets = [0, 0, 0], sizes = [1, 20, 1], strides = [1, 1, 1]} : vector<12x20x1xf32> to vector<1x20x1xf32>
      %33 = vector.shape_cast %32 : vector<1x20x1xf32> to vector<20x1xf32>
      %34 = vector.extract_strided_slice %31 {offsets = [2, 0, 0], sizes = [1, 20, 1], strides = [1, 1, 1]} : vector<12x20x1xf32> to vector<1x20x1xf32>
      %35 = vector.shape_cast %34 : vector<1x20x1xf32> to vector<20x1xf32>
      %36 = vector.extract_strided_slice %31 {offsets = [4, 0, 0], sizes = [1, 20, 1], strides = [1, 1, 1]} : vector<12x20x1xf32> to vector<1x20x1xf32>
      %37 = vector.shape_cast %36 : vector<1x20x1xf32> to vector<20x1xf32>
      %38 = vector.extract_strided_slice %31 {offsets = [6, 0, 0], sizes = [1, 20, 1], strides = [1, 1, 1]} : vector<12x20x1xf32> to vector<1x20x1xf32>
      %39 = vector.shape_cast %38 : vector<1x20x1xf32> to vector<20x1xf32>
      %40 = vector.extract_strided_slice %31 {offsets = [8, 0, 0], sizes = [1, 20, 1], strides = [1, 1, 1]} : vector<12x20x1xf32> to vector<1x20x1xf32>
      %41 = vector.shape_cast %40 : vector<1x20x1xf32> to vector<20x1xf32>
      %42 = vector.extract_strided_slice %31 {offsets = [10, 0, 0], sizes = [1, 20, 1], strides = [1, 1, 1]} : vector<12x20x1xf32> to vector<1x20x1xf32>
      %43 = vector.shape_cast %42 : vector<1x20x1xf32> to vector<20x1xf32>
      %44 = vector.broadcast %33 : vector<20x1xf32> to vector<20x256xf32>
      %45 = arith.mulf %44, %12 : vector<20x256xf32>
      %46 = arith.addf %2, %45 : vector<20x256xf32>
      %47 = vector.broadcast %35 : vector<20x1xf32> to vector<20x256xf32>
      %48 = arith.mulf %47, %13 : vector<20x256xf32>
      %49 = arith.subf %46, %48 : vector<20x256xf32>
      %50 = vector.broadcast %33 : vector<20x1xf32> to vector<20x256xf32>
      %51 = arith.mulf %50, %13 : vector<20x256xf32>
      %52 = arith.addf %5, %51 : vector<20x256xf32>
      %53 = vector.broadcast %35 : vector<20x1xf32> to vector<20x256xf32>
      %54 = arith.mulf %53, %12 : vector<20x256xf32>
      %55 = arith.addf %52, %54 : vector<20x256xf32>
      %56 = vector.broadcast %41 : vector<20x1xf32> to vector<20x256xf32>
      %57 = arith.mulf %49, %56 : vector<20x256xf32>
      %58 = vector.broadcast %37 : vector<20x1xf32> to vector<20x256xf32>
      %59 = arith.addf %58, %57 : vector<20x256xf32>
      %60 = vector.broadcast %43 : vector<20x1xf32> to vector<20x256xf32>
      %61 = arith.mulf %55, %60 : vector<20x256xf32>
      %62 = arith.subf %59, %61 : vector<20x256xf32>
      %63 = vector.broadcast %43 : vector<20x1xf32> to vector<20x256xf32>
      %64 = arith.mulf %49, %63 : vector<20x256xf32>
      %65 = vector.broadcast %39 : vector<20x1xf32> to vector<20x256xf32>
      %66 = arith.addf %65, %64 : vector<20x256xf32>
      %67 = vector.broadcast %41 : vector<20x1xf32> to vector<20x256xf32>
      %68 = arith.mulf %55, %67 : vector<20x256xf32>
      %69 = arith.addf %66, %68 : vector<20x256xf32>
      %70 = vector.extract_strided_slice %31 {offsets = [1, 0, 0], sizes = [1, 20, 1], strides = [1, 1, 1]} : vector<12x20x1xf32> to vector<1x20x1xf32>
      %71 = vector.shape_cast %70 : vector<1x20x1xf32> to vector<20x1xf32>
      %72 = vector.extract_strided_slice %31 {offsets = [3, 0, 0], sizes = [1, 20, 1], strides = [1, 1, 1]} : vector<12x20x1xf32> to vector<1x20x1xf32>
      %73 = vector.shape_cast %72 : vector<1x20x1xf32> to vector<20x1xf32>
      %74 = vector.extract_strided_slice %31 {offsets = [5, 0, 0], sizes = [1, 20, 1], strides = [1, 1, 1]} : vector<12x20x1xf32> to vector<1x20x1xf32>
      %75 = vector.shape_cast %74 : vector<1x20x1xf32> to vector<20x1xf32>
      %76 = vector.extract_strided_slice %31 {offsets = [7, 0, 0], sizes = [1, 20, 1], strides = [1, 1, 1]} : vector<12x20x1xf32> to vector<1x20x1xf32>
      %77 = vector.shape_cast %76 : vector<1x20x1xf32> to vector<20x1xf32>
      %78 = vector.extract_strided_slice %31 {offsets = [9, 0, 0], sizes = [1, 20, 1], strides = [1, 1, 1]} : vector<12x20x1xf32> to vector<1x20x1xf32>
      %79 = vector.shape_cast %78 : vector<1x20x1xf32> to vector<20x1xf32>
      %80 = vector.extract_strided_slice %31 {offsets = [11, 0, 0], sizes = [1, 20, 1], strides = [1, 1, 1]} : vector<12x20x1xf32> to vector<1x20x1xf32>
      %81 = vector.shape_cast %80 : vector<1x20x1xf32> to vector<20x1xf32>
      %82 = vector.broadcast %71 : vector<20x1xf32> to vector<20x256xf32>
      %83 = arith.mulf %82, %26 : vector<20x256xf32>
      %84 = arith.addf %16, %83 : vector<20x256xf32>
      %85 = vector.broadcast %73 : vector<20x1xf32> to vector<20x256xf32>
      %86 = arith.mulf %85, %27 : vector<20x256xf32>
      %87 = arith.subf %84, %86 : vector<20x256xf32>
      %88 = vector.broadcast %71 : vector<20x1xf32> to vector<20x256xf32>
      %89 = arith.mulf %88, %27 : vector<20x256xf32>
      %90 = arith.addf %19, %89 : vector<20x256xf32>
      %91 = vector.broadcast %73 : vector<20x1xf32> to vector<20x256xf32>
      %92 = arith.mulf %91, %26 : vector<20x256xf32>
      %93 = arith.addf %90, %92 : vector<20x256xf32>
      %94 = vector.broadcast %79 : vector<20x1xf32> to vector<20x256xf32>
      %95 = arith.mulf %87, %94 : vector<20x256xf32>
      %96 = vector.broadcast %75 : vector<20x1xf32> to vector<20x256xf32>
      %97 = arith.addf %96, %95 : vector<20x256xf32>
      %98 = vector.broadcast %81 : vector<20x1xf32> to vector<20x256xf32>
      %99 = arith.mulf %93, %98 : vector<20x256xf32>
      %100 = arith.subf %97, %99 : vector<20x256xf32>
      %101 = vector.broadcast %81 : vector<20x1xf32> to vector<20x256xf32>
      %102 = arith.mulf %87, %101 : vector<20x256xf32>
      %103 = vector.broadcast %77 : vector<20x1xf32> to vector<20x256xf32>
      %104 = arith.addf %103, %102 : vector<20x256xf32>
      %105 = vector.broadcast %79 : vector<20x1xf32> to vector<20x256xf32>
      %106 = arith.mulf %93, %105 : vector<20x256xf32>
      %107 = arith.addf %104, %106 : vector<20x256xf32>
      %108 = arith.mulf %62, %62 : vector<20x256xf32>
      %109 = arith.mulf %69, %69 : vector<20x256xf32>
      %110 = arith.addf %108, %109 : vector<20x256xf32>
      %cst = arith.constant 9.99999996E-13 : f32
      %111 = vector.broadcast %cst : f32 to vector<20x256xf32>
      %112 = arith.addf %110, %111 : vector<20x256xf32>
      %113 = math.rsqrt %112 : vector<20x256xf32>
      %114 = arith.mulf %100, %62 : vector<20x256xf32>
      %115 = arith.mulf %107, %69 : vector<20x256xf32>
      %116 = arith.addf %114, %115 : vector<20x256xf32>
      %117 = arith.mulf %116, %113 : vector<20x256xf32>
      %118 = vector.extract_strided_slice %117 {offsets = [0, 0], sizes = [2, 256], strides = [1, 1]} : vector<20x256xf32> to vector<2x256xf32>
      %119 = vector.extract_strided_slice %117 {offsets = [10, 0], sizes = [2, 256], strides = [1, 1]} : vector<20x256xf32> to vector<2x256xf32>
      %120 = vector.extract_strided_slice %117 {offsets = [2, 0], sizes = [2, 256], strides = [1, 1]} : vector<20x256xf32> to vector<2x256xf32>
      %121 = vector.extract_strided_slice %117 {offsets = [12, 0], sizes = [2, 256], strides = [1, 1]} : vector<20x256xf32> to vector<2x256xf32>
      %122 = vector.extract_strided_slice %117 {offsets = [4, 0], sizes = [2, 256], strides = [1, 1]} : vector<20x256xf32> to vector<2x256xf32>
      %cst_20 = arith.constant 5.000000e-01 : f32
      %123 = vector.broadcast %cst_20 : f32 to vector<2x256xf32>
      %124 = arith.addf %122, %123 : vector<2x256xf32>
      %125 = vector.extract_strided_slice %117 {offsets = [14, 0], sizes = [2, 256], strides = [1, 1]} : vector<20x256xf32> to vector<2x256xf32>
      %126 = vector.extract_strided_slice %117 {offsets = [6, 0], sizes = [2, 256], strides = [1, 1]} : vector<20x256xf32> to vector<2x256xf32>
      %127 = vector.extract_strided_slice %117 {offsets = [16, 0], sizes = [2, 256], strides = [1, 1]} : vector<20x256xf32> to vector<2x256xf32>
      %128 = vector.extract_strided_slice %117 {offsets = [8, 0], sizes = [2, 256], strides = [1, 1]} : vector<20x256xf32> to vector<2x256xf32>
      %cst_21 = arith.constant 1.000000e+00 : f32
      %129 = vector.broadcast %cst_21 : f32 to vector<2x256xf32>
      %130 = arith.addf %128, %129 : vector<2x256xf32>
      %131 = vector.extract_strided_slice %117 {offsets = [18, 0], sizes = [2, 256], strides = [1, 1]} : vector<20x256xf32> to vector<2x256xf32>
      %132 = arith.subf %120, %118 : vector<2x256xf32>
      %133 = arith.subf %121, %119 : vector<2x256xf32>
      %134 = arith.mulf %124, %132 : vector<2x256xf32>
      %135 = arith.addf %118, %134 : vector<2x256xf32>
      %136 = arith.mulf %125, %133 : vector<2x256xf32>
      %137 = arith.subf %135, %136 : vector<2x256xf32>
      %138 = arith.mulf %124, %133 : vector<2x256xf32>
      %139 = arith.addf %119, %138 : vector<2x256xf32>
      %140 = arith.mulf %125, %132 : vector<2x256xf32>
      %141 = arith.addf %139, %140 : vector<2x256xf32>
      %142 = arith.mulf %137, %130 : vector<2x256xf32>
      %143 = arith.addf %126, %142 : vector<2x256xf32>
      %144 = arith.mulf %141, %131 : vector<2x256xf32>
      %145 = arith.subf %143, %144 : vector<2x256xf32>
      %146 = arith.mulf %137, %131 : vector<2x256xf32>
      %147 = arith.addf %127, %146 : vector<2x256xf32>
      %148 = arith.mulf %141, %130 : vector<2x256xf32>
      %149 = arith.addf %147, %148 : vector<2x256xf32>
      %150 = vector.extract_strided_slice %145 {offsets = [0, 0], sizes = [1, 256], strides = [1, 1]} : vector<2x256xf32> to vector<1x256xf32>
      %151 = vector.extract_strided_slice %145 {offsets = [1, 0], sizes = [1, 256], strides = [1, 1]} : vector<2x256xf32> to vector<1x256xf32>
      %152 = vector.extract_strided_slice %149 {offsets = [0, 0], sizes = [1, 256], strides = [1, 1]} : vector<2x256xf32> to vector<1x256xf32>
      %153 = vector.extract_strided_slice %149 {offsets = [1, 0], sizes = [1, 256], strides = [1, 1]} : vector<2x256xf32> to vector<1x256xf32>
      %154 = arith.mulf %150, %150 : vector<1x256xf32>
      %155 = arith.mulf %152, %152 : vector<1x256xf32>
      %156 = arith.addf %154, %155 : vector<1x256xf32>
      %cst_22 = arith.constant 9.99999996E-13 : f32
      %157 = vector.broadcast %cst_22 : f32 to vector<1x256xf32>
      %158 = arith.addf %156, %157 : vector<1x256xf32>
      %159 = math.rsqrt %158 : vector<1x256xf32>
      %160 = arith.mulf %151, %150 : vector<1x256xf32>
      %161 = arith.mulf %153, %152 : vector<1x256xf32>
      %162 = arith.addf %160, %161 : vector<1x256xf32>
      %163 = arith.mulf %162, %159 : vector<1x256xf32>
      %164 = arith.index_cast %arg5 : i32 to index
      %c0_23 = arith.constant 0 : index
      %c0_24 = arith.constant 0 : index
      %165 = vector.load %arg4[%164, %c0_23, %c0_24] : memref<2x1x256xf32, #tpu.memory_space<vmem>>, vector<1x1x256xf32>
      %166 = vector.shape_cast %165 : vector<1x1x256xf32> to vector<1x256xf32>
      %167 = vector.shape_cast %163 : vector<1x256xf32> to vector<1x1x256xf32>
      tpu.vector_store %arg4[%164, %c0_23, %c0_24], %167 {strides = array<i32>} : memref<2x1x256xf32, #tpu.memory_space<vmem>>, vector<1x1x256xf32>,
    }
    %c2_i32_16 = arith.constant 2 : i32
    return
  }
  func.func @transform_0(%arg0: i32, %arg1: i32) -> (i32, i32, i32, i32) {
    %c0_i32 = arith.constant 0 : i32
    %c0_i32_0 = arith.constant 0 : i32
    %c0_i32_1 = arith.constant 0 : i32
    %c0_i32_2 = arith.constant 0 : i32
    return %arg1, %c0_i32, %c0_i32_0, %c0_i32_1 : i32, i32, i32, i32
  }
  func.func @transform_1(%arg0: i32, %arg1: i32) -> (i32, i32, i32) {
    %c0_i32 = arith.constant 0 : i32
    %c0_i32_0 = arith.constant 0 : i32
    %c0_i32_1 = arith.constant 0 : i32
    return %c0_i32, %c0_i32_0, %arg0 : i32, i32, i32
  }
  func.func @transform_2(%arg0: i32, %arg1: i32) -> (i32, i32, i32) {
    %c0_i32 = arith.constant 0 : i32
    %c0_i32_0 = arith.constant 0 : i32
    return %arg1, %c0_i32, %arg0 : i32, i32, i32
  }
}

</mosaic_0001>

<bundles_post_ra>
// kernel: tpu_custom_call.1
= control target key start
LH: loop header
LB: loop body
LE: loop exit
PB: predicated region body
PF: predicated region fallthrough
CT: control target
= control target key end

     0   :  { %7 = vsyncpa [#allocation3], 0  ;;  %s1561_s0 = inlined_call_operand.vmem [shape: f32[2,12,20,1], index: 0, kind: input, shape index: {}]   ;;  %s1562_s1 = inlined_call_operand.vmem [shape: bf16[8,20,256], index: 1, kind: input, shape index: {}]   ;;  %s1563_s2 = inlined_call_operand.hbm [shape: f32[2,1,256], index: 2, kind: output, shape index: {}]  }
   0x1   :  { %v977_v0 = vld [vmem:[%s1562_s1] sm:$0xff]  ;;  %v982_v1 = vld [vmem:[%s1562_s1 + $0x8] sm:$0xff]  ;;  %v987_v2 = vld [vmem:[%s1562_s1 + $0x10] sm:$0x33] }
   0x2   :  { %1633 = vst [vmem:[#allocation5_spill] sm:$0xff] %v977_v0  ;;  %v1583_v3 = vunpack.c.l.bf16 %v977_v0  ;;  %v1582_v4 = vunpack.c.h.bf16 %v977_v0  ;;  %v1567_v5 = vunpack.c.l.bf16 %v982_v1  ;;  %v1566_v6 = vunpack.c.h.bf16 %v982_v1  ;;  %v996_v7 = vld [vmem:[%s1562_s1 + $0x30] sm:$0xff]  ;;  %v1001_v8 = vld [vmem:[%s1562_s1 + $0x38] sm:$0xff]  ;;  %v1008_v11 = vld [vmem:[%s1562_s1 + $0x40] sm:$0x33] }
   0x3   :  { %1634 = vst [vmem:[#allocation6_spill] sm:$0xff] %v982_v1  ;;  %v1584_v9 = vunpack.c.l.bf16 %v987_v2  ;;  %v1587_v10 = vunpack.c.h.bf16 %v987_v2  ;;  %v1581_v12 = vunpack.c.l.bf16 %v996_v7  ;;  %v1580_v13 = vunpack.c.h.bf16 %v996_v7  ;;  %v871_v14 = vld [vmem:[%s1562_s1 + $0x60] sm:$0xff]  ;;  %v872_v15 = vld [vmem:[%s1562_s1 + $0x68] sm:$0xff]  ;;  %v873_v20 = vld [vmem:[%s1562_s1 + $0x70] sm:$0x33] }
   0x4   :  { %1635 = vst [vmem:[#allocation7_spill] sm:$0xff] %v987_v2  ;;  %v1565_v16 = vunpack.c.l.bf16 %v1001_v8  ;;  %v1564_v17 = vunpack.c.h.bf16 %v1001_v8  ;;  %v1590_v18 = vunpack.c.l.bf16 %v1008_v11  ;;  %v1591_v19 = vunpack.c.h.bf16 %v1008_v11  ;;  %v874_v21 = vld [vmem:[%s1562_s1 + $0x90] sm:$0xff]  ;;  %v875_v22 = vld [vmem:[%s1562_s1 + $0x98] sm:$0xff]  ;;  %v876_v27 = vld [vmem:[%s1562_s1 + $0xa0] sm:$0x33] }
   0x5   :  { %1636 = vst [vmem:[#allocation8_spill] sm:$0xff] %v996_v7  ;;  %v35_v23 = vunpack.c.l.bf16 %v871_v14  ;;  %v36_v24 = vunpack.c.h.bf16 %v871_v14  ;;  %v37_v25 = vunpack.c.l.bf16 %v872_v15  ;;  %v38_v26 = vunpack.c.h.bf16 %v872_v15  ;;  %v1053_v40 = vld [vmem:[%s1562_s1 + $0x18] sm:$0xff]  ;;  %v1058_v41 = vld [vmem:[%s1562_s1 + $0x20] sm:$0xff]  ;;  %v1079_v46 = vld [vmem:[%s1562_s1 + $0x28] sm:$0x33] }
   0x6   :  { %1637 = vst [vmem:[#allocation9_spill] sm:$0xff] %v1001_v8  ;;  %v39_v28 = vunpack.c.l.bf16 %v873_v20  ;;  %v40_v29 = vunpack.c.h.bf16 %v873_v20  ;;  %v45_v30 = vunpack.c.l.bf16 %v874_v21  ;;  %v46_v31 = vunpack.c.h.bf16 %v874_v21  ;;  %v1084_v47 = vld [vmem:[%s1562_s1 + $0x48] sm:$0xff]  ;;  %v1105_v52 = vld [vmem:[%s1562_s1 + $0x50] sm:$0xff]  ;;  %v1110_v53 = vld [vmem:[%s1562_s1 + $0x58] sm:$0x33] }
   0x7   :  { %1638 = vst [vmem:[#allocation10_spill] sm:$0xff] %v1008_v11  ;;  %v47_v32 = vunpack.c.l.bf16 %v875_v22  ;;  %v48_v33 = vunpack.c.h.bf16 %v875_v22  ;;  %v49_v34 = vunpack.c.l.bf16 %v876_v27  ;;  %v50_v35 = vunpack.c.h.bf16 %v876_v27  ;;  %v883_v58 = vld [vmem:[%s1562_s1 + $0x78] sm:$0xff]  ;;  %v884_v59 = vld [vmem:[%s1562_s1 + $0x80] sm:$0xff]  ;;  %v885_v14 = vld [vmem:[%s1562_s1 + $0x88] sm:$0x33] }
   0x8   :  { %v1036_v36 = vsub.f32 %v35_v23, %v1583_v3  ;;  %v1040_v37 = vsub.f32 %v36_v24, %v1582_v4  ;;  %v1044_v38 = vsub.f32 %v37_v25, %v1567_v5  ;;  %v1048_v39 = vsub.f32 %v38_v26, %v1566_v6  ;;  %1643 = vst [vmem:[#allocation15_spill] sm:$0xff] %v1053_v40  ;;  %v886_v15 = vld [vmem:[%s1562_s1 + $0xa8] sm:$0xff]  ;;  %v887_v24 = vld [vmem:[%s1562_s1 + $0xb0] sm:$0xff]  ;;  %v888_v25 = vld [vmem:[%s1562_s1 + $0xb8] sm:$0x33]  ;;  %s1190_s1 = smov 0  }
   0x9   :  { %1644 = vst [vmem:[#allocation16_spill] sm:$0xff] %v1058_v41  ;;  %v1062_v42 = vsub.f32 %v39_v28, %v1584_v9  ;;  %v1066_v43 = vsub.f32 %v40_v29, %v1587_v10  ;;  %v1070_v44 = vsub.f32 %v45_v30, %v1581_v12  ;;  %v1074_v45 = vsub.f32 %v46_v31, %v1580_v13 }
   0xa   :  { %1639 = vst [vmem:[#allocation11_spill] sm:$0xff] %v1036_v36  ;;  %v1088_v48 = vsub.f32 %v47_v32, %v1565_v16  ;;  %v1092_v49 = vsub.f32 %v48_v33, %v1564_v17  ;;  %v1096_v50 = vsub.f32 %v49_v34, %v1590_v18  ;;  %v1100_v51 = vsub.f32 %v50_v35, %v1591_v19 }
   0xb   :  { %1640 = vst [vmem:[#allocation12_spill] sm:$0xff] %v1040_v37  ;;  %v1579_v54 = vunpack.c.l.bf16 %v1053_v40  ;;  %v1577_v55 = vunpack.c.h.bf16 %v1053_v40  ;;  %v1578_v56 = vunpack.c.l.bf16 %v1058_v41  ;;  %v1575_v57 = vunpack.c.h.bf16 %v1058_v41 }
   0xc   :  { %1641 = vst [vmem:[#allocation13_spill] sm:$0xff] %v1044_v38  ;;  %v1571_v60 = vunpack.c.l.bf16 %v1079_v46  ;;  %v1570_v61 = vunpack.c.h.bf16 %v1079_v46  ;;  %v1576_v62 = vunpack.c.l.bf16 %v1084_v47  ;;  %v1573_v63 = vunpack.c.h.bf16 %v1084_v47 }
   0xd   :  { %1642 = vst [vmem:[#allocation14_spill] sm:$0xff] %v1048_v39  ;;  %v1574_v20 = vunpack.c.l.bf16 %v1105_v52  ;;  %v1572_v21 = vunpack.c.h.bf16 %v1105_v52  ;;  %v1569_v22 = vunpack.c.l.bf16 %v1110_v53  ;;  %v1568_v23 = vunpack.c.h.bf16 %v1110_v53 }
   0xe   :  { %1645 = vst [vmem:[#allocation17_spill] sm:$0xff] %v1062_v42  ;;  %v87_v26 = vunpack.c.l.bf16 %v883_v58  ;;  %v88_v27 = vunpack.c.h.bf16 %v883_v58  ;;  %v89_v28 = vunpack.c.l.bf16 %v884_v59  ;;  %v90_v29 = vunpack.c.h.bf16 %v884_v59 }
   0xf   :  { %1646 = vst [vmem:[#allocation18_spill] sm:$0xff] %v1066_v43  ;;  %v91_v30 = vunpack.c.l.bf16 %v885_v14  ;;  %v92_v31 = vunpack.c.h.bf16 %v885_v14  ;;  %v97_v32 = vunpack.c.l.bf16 %v886_v15  ;;  %v98_v33 = vunpack.c.h.bf16 %v886_v15 }
  0x10   :  { %1647 = vst [vmem:[#allocation19_spill] sm:$0xff] %v1070_v44  ;;  %v99_v34 = vunpack.c.l.bf16 %v887_v24  ;;  %v100_v35 = vunpack.c.h.bf16 %v887_v24  ;;  %v101_v17 = vunpack.c.l.bf16 %v888_v25  ;;  %v102_v16 = vunpack.c.h.bf16 %v888_v25 }
  0x11   :  { %1648 = vst [vmem:[#allocation20_spill] sm:$0xff] %v1074_v45  ;;  %v1144_v6 = vsub.f32 %v87_v26, %v1579_v54  ;;  %v1148_v5 = vsub.f32 %v88_v27, %v1577_v55  ;;  %v1152_v58 = vsub.f32 %v89_v28, %v1578_v56  ;;  %v1156_v59 = vsub.f32 %v90_v29, %v1575_v57 }
  0x12   :  { %1649 = vst [vmem:[#allocation21_spill] sm:$0xff] %v1079_v46  ;;  %v1160_v14 = vsub.f32 %v91_v30, %v1571_v60  ;;  %v1164_v15 = vsub.f32 %v92_v31, %v1570_v61  ;;  %v1168_v24 = vsub.f32 %v97_v32, %v1576_v62  ;;  %v1172_v25 = vsub.f32 %v98_v33, %v1573_v63 }
  0x13   :  { %1650 = vst [vmem:[#allocation22_spill] sm:$0xff] %v1084_v47  ;;  %v1176_v26 = vsub.f32 %v99_v34, %v1574_v20  ;;  %v1180_v27 = vsub.f32 %v100_v35, %v1572_v21  ;;  %v1184_v28 = vsub.f32 %v101_v17, %v1569_v22  ;;  %v1188_v29 = vsub.f32 %v102_v16, %v1568_v23 }
  0x14   :  { %1651 = vst [vmem:[#allocation23_spill] sm:$0xff] %v1088_v48 }
  0x15   :  { %1652 = vst [vmem:[#allocation24_spill] sm:$0xff] %v1092_v49 }
  0x16   :  { %1653 = vst [vmem:[#allocation25_spill] sm:$0xff] %v1096_v50 }
  0x17   :  { %1654 = vst [vmem:[#allocation26_spill] sm:$0xff] %v1100_v51 }
  0x18   :  { %1655 = vst [vmem:[#allocation27_spill] sm:$0xff] %v1105_v52 }
  0x19   :  { %1656 = vst [vmem:[#allocation28_spill] sm:$0xff] %v1110_v53 }
  0x1a   :  { %1657 = vst [vmem:[#allocation29_spill] sm:$0xff] %v1144_v6 }
  0x1b   :  { %1658 = vst [vmem:[#allocation30_spill] sm:$0xff] %v1148_v5 }
  0x1c   :  { %1659 = vst [vmem:[#allocation31_spill] sm:$0xff] %v1164_v15 }
  0x1d   :  { %1660 = vst [vmem:[#allocation32_spill] sm:$0xff] %v1168_v24 }
  0x1e   :  { %1661 = vst [vmem:[#allocation33_spill] sm:$0xff] %v1172_v25 }
  0x1f   :  { %1662 = vst [vmem:[#allocation34_spill] sm:$0xff] %v1176_v26 }
  0x20   :  { %1663 = vst [vmem:[#allocation35_spill] sm:$0xff] %v1180_v27 }
  0x21   :  { %1664 = vst [vmem:[#allocation36_spill] sm:$0xff] %v1184_v28 }
  0x22   :  { %1665 = vst [vmem:[#allocation37_spill] sm:$0xff] %v1188_v29 }
  0x23 LB: > { %v1666_v52 = vld [vmem:[#allocation27_spill] sm:$0xff]  ;;  %v1667_v47 = vld [vmem:[#allocation22_spill] sm:$0xff]  ;;  %v1668_v41 = vld [vmem:[#allocation16_spill] sm:$0xff]  ;;  %v955_v30 = vmov 0   ;;  %s121_s29 = smul.u32 288, %s953_s1  ;;  %s889_s5 = sshll.u32 %s953_s1, 1  ;;  %s953_s1 = sphi %s1190_s1, %s120_s1  }
  0x24   : > { %v1669_v40 = vld [vmem:[#allocation15_spill] sm:$0xff]  ;;  %v1670_v37 = vld [vmem:[#allocation12_spill] sm:$0xff]  ;;  %v1675_v6 = vld [vmem:[#allocation29_spill] sm:$0xff]  ;;  %904 = vset.pattern.permute.xlu2 %v955_v30  ;;  %903 = vset.pattern.permute.xlu1 %v955_v30  ;;  %s835_s6 = scalar_lea.vmem [#allocation2], %s889_s5  ;;  %s120_s1 = sadd.s32 1, %s953_s1  }
  0x25   : > { %v1673_v25 = vld [vmem:[#allocation33_spill] sm:$0xff]  ;;  %v1674_v24 = vld [vmem:[#allocation32_spill] sm:$0xff]  ;;  %v1676_v5 = vld [vmem:[#allocation30_spill] sm:$0xff]  ;;  %902 = vset.pattern.permute.xlu0 %v955_v30  ;;  %s1199_s4 = scalar_lea.vmem %s1561_s0, %s121_s29  ;;  %p117_p0 = scmp.ge.s32.totalorder %s120_s1, 2  }
  0x26   : > { %v1672_v26 = vld [vmem:[#allocation34_spill] sm:$0xff]  ;;  %v1677_v36 = vld [vmem:[#allocation11_spill] sm:$0xff]  ;;  %v1678_v8 = vld [vmem:[#allocation9_spill] sm:$0xff]  ;;  %s847_s9 = sshll.u32 (%p117_p0), %s1563_s2, 4  ;;  %s956_s10 = smov (%p117_p0), [#allocation2]   ;;  %s848_s9 = int_to_ptr.hbm [resolvable:$true] %s847_s9 }
  0x27   : > { %v1671_v27 = vld [vmem:[#allocation35_spill] sm:$0xff]  ;;  %v1679_v45 = vld [vmem:[#allocation20_spill] sm:$0xff]  ;;  %v1682_v1 = vld [vmem:[#allocation6_spill] sm:$0xff]  ;;  %s845_s11 = sshll.u32 (%p117_p0), %s956_s10, 4  ;;  %s957_s12 = smov (%p117_p0), 32   ;;  %s846_s11 = int_to_ptr.vmem [resolvable:$true] %s845_s11 }
  0x28   : > { %v1680_v44 = vld [vmem:[#allocation19_spill] sm:$0xff]  ;;  %v1681_v7 = vld [vmem:[#allocation8_spill] sm:$0xff]  ;;  %v1683_v0 = vld [vmem:[#allocation5_spill] sm:$0xff]  ;;  %s958_s13 = smov (%p117_p0), 2  }
  0x29   : > { %v1684_v49 = vld [vmem:[#allocation24_spill] sm:$0xff]  ;;  %v1685_v39 = vld [vmem:[#allocation14_spill] sm:$0xff]  ;;  %v1686_v38 = vld [vmem:[#allocation13_spill] sm:$0xff] }
  0x2a   : > { %v1687_v48 = vld [vmem:[#allocation23_spill] sm:$0xff]  ;;  %v1688_v51 = vld [vmem:[#allocation26_spill] sm:$0xff]  ;;  %v1691_v50 = vld [vmem:[#allocation25_spill] sm:$0xff] }
  0x2b   : > { %v1689_v43 = vld [vmem:[#allocation18_spill] sm:$0xff]  ;;  %v1692_v42 = vld [vmem:[#allocation17_spill] sm:$0xff]  ;;  %v1693_v2 = vld [vmem:[#allocation7_spill] sm:$0xff] }
  0x2c   : > { %v1690_v11 = vld [vmem:[#allocation10_spill] sm:$0xff]  ;;  %v125_v17 = vld [vmem:[%s1199_s4 + $0x10] sm:$0xf]  ;;  %v123_v31 = vld [vmem:[%s1199_s4] sm:$0xff]  ;;  %v1694_v9 = vunpack.c.l.bf16 %v1693_v2  ;;  %v1695_v10 = vunpack.c.h.bf16 %v1693_v2 }
  0x2d   : > { %v130_v16 = vld [vmem:[%s1199_s4 + $0x38] sm:$0xff]  ;;  %171 = vperm.xlu1 %903, %v125_v17   ;;  %161 = vperm.xlu0 %902, %v123_v31   ;;  %v131_v32 = vld [vmem:[%s1199_s4 + $0x40] sm:$0xf]  ;;  %v129_v33 = vld [vmem:[%s1199_s4 + $0x30] sm:$0xff]  ;;  %v1696_v18 = vunpack.c.l.bf16 %v1690_v11  ;;  %v1697_v19 = vunpack.c.h.bf16 %v1690_v11 }
  0x2e   : > { %193 = vperm.xlu2 %904, %v130_v16   ;;  %v124_v34 = vld [vmem:[%s1199_s4 + $0x8] sm:$0xff]  ;;  %v149_v35 = vld [vmem:[%s1199_s4 + $0xd0] sm:$0xf]  ;;  %v147_v23 = vld [vmem:[%s1199_s4 + $0xc0] sm:$0xff] }
  0x2f   : > { %v148_v30 = vld [vmem:[%s1199_s4 + $0xc8] sm:$0xff]  ;;  %v137_v16 = vld [vmem:[%s1199_s4 + $0x70] sm:$0xf]  ;;  %v135_v31 = vld [vmem:[%s1199_s4 + $0x60] sm:$0xff] }
  0x30   : > { %v136_v17 = vld [vmem:[%s1199_s4 + $0x68] sm:$0xff]  ;;  %v134_v22 = vld [vmem:[%s1199_s4 + $0x58] sm:$0xf] }
  0x31   : > { %v140_v61 = vld [vmem:[%s1199_s4 + $0x88] sm:$0xf]  ;;  %v158_v60 = vld [vmem:[%s1199_s4 + $0x118] sm:$0xf] }
  0x35   : > { %188 = vperm.xlu1 %903, %v129_v33   ;;  %166 = vperm.xlu0 %902, %v124_v34   ;;  %v154_v33 = vld [vmem:[%s1199_s4 + $0xf8] sm:$0xff]  ;;  %v153_v34 = vld [vmem:[%s1199_s4 + $0xf0] sm:$0xff] }
  0x36   : > { %198 = vperm.xlu2 %904, %v131_v32   ;;  %v155_v32 = vld [vmem:[%s1199_s4 + $0x100] sm:$0xf] }
  0x3d   : > { %244 = vperm.xlu1 %903, %v148_v30   ;;  %239 = vperm.xlu0 %902, %v147_v23   ;;  %v142_v23 = vld [vmem:[%s1199_s4 + $0x98] sm:$0xff]  ;;  %v141_v30 = vld [vmem:[%s1199_s4 + $0x90] sm:$0xff] }
  0x3e   : > { %249 = vperm.xlu2 %904, %v149_v35   ;;  %v143_v35 = vld [vmem:[%s1199_s4 + $0xa0] sm:$0xf] }
  0x45   : > { %265 = vperm.xlu1 %903, %v136_v17   ;;  %260 = vperm.xlu0 %902, %v135_v31   ;;  %v127_v17 = vld [vmem:[%s1199_s4 + $0x20] sm:$0xff]  ;;  %v126_v31 = vld [vmem:[%s1199_s4 + $0x18] sm:$0xff] }
  0x46   : > { %270 = vperm.xlu2 %904, %v137_v16   ;;  %v132_v16 = vld [vmem:[%s1199_s4 + $0x48] sm:$0xff] }
  0x4d   : > { %286 = vperm.xlu1 %903, %v154_v33   ;;  %281 = vperm.xlu0 %902, %v153_v34   ;;  %v150_v33 = vld [vmem:[%s1199_s4 + $0xd8] sm:$0xff]  ;;  %v133_v34 = vld [vmem:[%s1199_s4 + $0x50] sm:$0xff] }
  0x4e   : > { %291 = vperm.xlu2 %904, %v155_v32   ;;  %v156_v32 = vld [vmem:[%s1199_s4 + $0x108] sm:$0xff] }
  0x55   : > { %319 = vperm.xlu1 %903, %v142_v23   ;;  %314 = vperm.xlu0 %902, %v141_v30   ;;  %v138_v23 = vld [vmem:[%s1199_s4 + $0x78] sm:$0xff]  ;;  %v151_v30 = vld [vmem:[%s1199_s4 + $0xe0] sm:$0xff] }
  0x56   : > { %324 = vperm.xlu2 %904, %v143_v35   ;;  %v157_v35 = vld [vmem:[%s1199_s4 + $0x110] sm:$0xff] }
  0x5d   : > { %352 = vperm.xlu1 %903, %v127_v17   ;;  %347 = vperm.xlu0 %902, %v126_v31   ;;  %v139_v17 = vld [vmem:[%s1199_s4 + $0x80] sm:$0xff]  ;;  %v144_v31 = vld [vmem:[%s1199_s4 + $0xa8] sm:$0xff] }
  0x5e   : > { %374 = vperm.xlu2 %904, %v132_v16   ;;  %v145_v16 = vld [vmem:[%s1199_s4 + $0xb0] sm:$0xff] }
  0x65   : > { %425 = vperm.xlu1 %903, %v150_v33   ;;  %379 = vperm.xlu0 %902, %v133_v34   ;;  %v128_v33 = vld [vmem:[%s1199_s4 + $0x28] sm:$0xf]  ;;  %v146_v34 = vld [vmem:[%s1199_s4 + $0xb8] sm:$0xf] }
  0x66   : > { %467 = vperm.xlu2 %904, %v156_v32   ;;  %v152_v32 = vld [vmem:[%s1199_s4 + $0xe8] sm:$0xf] }
  0x6d   : > { %446 = vperm.xlu1 %903, %v138_v23   ;;  %430 = vperm.xlu0 %902, %v151_v30  }
  0x6e   : > { %472 = vperm.xlu2 %904, %v157_v35  }
  0x75   : > { %451 = vperm.xlu1 %903, %v139_v17   ;;  %500 = vperm.xlu0 %902, %v144_v31  }
  0x76   : > { %505 = vperm.xlu2 %904, %v145_v16  }
  0x7d   : > { %384 = vperm.xlu1 %903, %v134_v22   ;;  %357 = vperm.xlu0 %902, %v128_v33  }
  0x7e   : > { %435 = vperm.xlu2 %904, %v152_v32  }
  0x85   : > { %456 = vperm.xlu1 %903, %v140_v61   ;;  %477 = vperm.xlu0 %902, %v158_v60  }
  0x86   : > { %510 = vperm.xlu2 %904, %v146_v34  }
  0x88   : > { %v194_v35 = vpop.permute.xlu2 %193 }
  0x90   : > { %v199_v23 = vpop.permute.xlu2 %198 }
  0x91   : > { %v205_v61 = vmul.f32 %v199_v23, %v1691_v50  ;;  %v206_v34 = vmul.f32 %v199_v23, %v1688_v51  ;;  %v229_v54 = vmul.f32 %v199_v23, %v1692_v42  ;;  %v230_v12 = vmul.f32 %v199_v23, %v1689_v43 }
  0x98   : > { %v250_v30 = vpop.permute.xlu2 %249 }
  0x9f   : > { %v172_v21 = vpop.permute.xlu1 %171  ;;  %v162_v63 = vpop.permute.xlu0 %161 }
  0xa0   : > { %v271_v31 = vpop.permute.xlu2 %270  ;;  %v178_v20 = vmul.f32 %v172_v21, %v1692_v42  ;;  %v179_v32 = vmul.f32 %v172_v21, %v1689_v43  ;;  %v217_v33 = vmul.f32 %v172_v21, %v1691_v50  ;;  %v218_v60 = vmul.f32 %v172_v21, %v1688_v51 }
  0xa1   : > { %v174_v4 = vmul.f32 %v162_v63, %v1677_v36  ;;  %v175_v3 = vmul.f32 %v162_v63, %v1670_v37  ;;  %v1700_v43 = vunpack.c.l.bf16 %v1681_v7 }
  0xa2   : > { %v184_v62 = vadd.f32 %v178_v20, %v1694_v9  ;;  %v185_v55 = vadd.f32 %v179_v32, %v1695_v10  ;;  %v223_v13 = vadd.f32 %v217_v33, %v1696_v18  ;;  %v224_v21 = vadd.f32 %v218_v60, %v1697_v19 }
  0xa3   : > { %v213_v20 = vmul.f32 %v162_v63, %v1680_v44  ;;  %v214_v10 = vmul.f32 %v162_v63, %v1679_v45  ;;  %v203_v18 = vmul.f32 %v194_v35, %v1687_v48  ;;  %v204_v60 = vmul.f32 %v194_v35, %v1684_v49 }
  0xa4   : > { %v211_v9 = vsub.f32 %v184_v62, %v205_v61  ;;  %v212_v2 = vsub.f32 %v185_v55, %v206_v34  ;;  %v235_v42 = vadd.f32 %v229_v54, %v223_v13  ;;  %v227_v62 = vmul.f32 %v194_v35, %v1686_v38 }
  0xa5   : > { %v228_v55 = vmul.f32 %v194_v35, %v1685_v39  ;;  %v1698_v63 = vunpack.c.l.bf16 %v1683_v0  ;;  %v236_v54 = vadd.f32 %v230_v12, %v224_v21  ;;  %v1699_v61 = vunpack.c.h.bf16 %v1683_v0 }
  0xa6   : > { %v219_v51 = vadd.f32 %v213_v20, %v1700_v43  ;;  %v256_v53 = vmul.f32 %v250_v30, %v211_v9  ;;  %v257_v29 = vmul.f32 %v250_v30, %v212_v2  ;;  %v1703_v35 = vunpack.c.h.bf16 %v1682_v1 }
  0xa7   : > { %v189_v16 = vpop.permute.xlu1 %188  ;;  %v167_v17 = vpop.permute.xlu0 %166  ;;  %v180_v13 = vadd.f32 %v174_v4, %v1698_v63  ;;  %v181_v34 = vadd.f32 %v175_v3, %v1699_v61  ;;  %v1704_v3 = vunpack.c.l.bf16 %v1678_v8  ;;  %v1705_v43 = vunpack.c.h.bf16 %v1678_v8 }
  0xa8   : > { %v292_v56 = vpop.permute.xlu2 %291  ;;  %v176_v50 = vmul.f32 %v167_v17, %v1686_v38  ;;  %v177_v33 = vmul.f32 %v167_v17, %v1685_v39  ;;  %v215_v19 = vmul.f32 %v167_v17, %v1687_v48  ;;  %v216_v11 = vmul.f32 %v167_v17, %v1684_v49 }
  0xa9   : > { %v1701_v48 = vunpack.c.h.bf16 %v1681_v7  ;;  %v1702_v17 = vunpack.c.l.bf16 %v1682_v1  ;;  %v337_v49 = vmul.f32 %v250_v30, %v235_v42  ;;  %v201_v4 = vmul.f32 %v189_v16, %v1680_v44 }
  0xaa   : > { %v183_v39 = vadd.f32 %v177_v33, %v1703_v35  ;;  %v202_v12 = vmul.f32 %v189_v16, %v1679_v45  ;;  %v221_v21 = vadd.f32 %v215_v19, %v1704_v3  ;;  %v222_v20 = vadd.f32 %v216_v11, %v1705_v43 }
  0xab   : > { %v220_v28 = vadd.f32 %v214_v10, %v1701_v48  ;;  %v182_v38 = vadd.f32 %v176_v50, %v1702_v17  ;;  %v225_v10 = vmul.f32 %v189_v16, %v1677_v36  ;;  %v226_v48 = vmul.f32 %v189_v16, %v1670_v37 }
  0xac   : > { %v310_v50 = vmul.f32 %v292_v56, %v211_v9  ;;  %v338_v61 = vmul.f32 %v250_v30, %v236_v54  ;;  %v298_v17 = vmul.f32 %v292_v56, %v235_v42  ;;  %v299_v33 = vmul.f32 %v292_v56, %v236_v54 }
  0xad   : > { %v277_v35 = vadd.f32 %v271_v31, %v256_v53  ;;  %v278_v0 = vadd.f32 %v271_v31, %v257_v29  ;;  %v311_v7 = vmul.f32 %v292_v56, %v212_v2  ;;  %v209_v45 = vsub.f32 %v182_v38, %v203_v18 }
  0xae   : > { %v210_v46 = vsub.f32 %v183_v39, %v204_v60  ;;  %v207_v3 = vsub.f32 %v180_v13, %v201_v4  ;;  %v208_v8 = vsub.f32 %v181_v34, %v202_v12  ;;  %v233_v11 = vadd.f32 %v227_v62, %v221_v21 }
  0xaf   : > { %v1239_v22 = vpop.permute.xlu1 %244  ;;  %v1242_v57 = vpop.permute.xlu0 %239  ;;  %v234_v43 = vadd.f32 %v228_v55, %v222_v20  ;;  %v231_v16 = vadd.f32 %v225_v10, %v219_v51  ;;  %v232_v9 = vadd.f32 %v226_v48, %v220_v28 }
  0xb0   : > { %v325_v63 = vpop.permute.xlu2 %324  ;;  %v254_v36 = vmul.f32 %v1239_v22, %v209_v45  ;;  %v255_v42 = vmul.f32 %v1239_v22, %v210_v46  ;;  %v252_v53 = vmul.f32 %v1242_v57, %v207_v3  ;;  %v253_v29 = vmul.f32 %v1242_v57, %v208_v8 }
  0xb1   : > { %v331_v44 = vadd.f32 %v325_v63, %v310_v50  ;;  %v332_v15 = vadd.f32 %v325_v63, %v311_v7  ;;  %v335_v2 = vmul.f32 %v1239_v22, %v233_v11  ;;  %v336_v56 = vmul.f32 %v1239_v22, %v234_v43 }
  0xb2   : > { %v333_v31 = vmul.f32 %v1242_v57, %v231_v16  ;;  %v334_v51 = vmul.f32 %v1242_v57, %v232_v9  ;;  %v1311_v57 = vsub.f32 %v278_v0, %v299_v33 }
  0xb3   : > { %v1294_v18 = vadd.f32 %v337_v49, %v331_v44 }
  0xb5   : > { %v541_v48 = vmul.f32 %v1294_v18, %v1294_v18 }
  0xb7   : > { %v266_v32 = vpop.permute.xlu1 %265  ;;  %v261_v23 = vpop.permute.xlu0 %260 }
  0xb8   : > { %v275_v28 = vadd.f32 %v266_v32, %v254_v36  ;;  %v276_v60 = vadd.f32 %v266_v32, %v255_v42  ;;  %v1299_v13 = vpop.permute.xlu2 %374  ;;  %v273_v54 = vadd.f32 %v261_v23, %v252_v53  ;;  %v274_v34 = vadd.f32 %v261_v23, %v253_v29 }
  0xb9   : > { %v1317_v23 = vadd.f32 %v338_v61, %v332_v15 }
  0xbb   : > { %v542_v42 = vmul.f32 %v1317_v23, %v1317_v23 }
  0xbf   : > { %v287_v1 = vpop.permute.xlu1 %286  ;;  %v282_v19 = vpop.permute.xlu0 %281 }
  0xc0   : > { %v296_v38 = vmul.f32 %v287_v1, %v233_v11  ;;  %v297_v39 = vmul.f32 %v287_v1, %v234_v43  ;;  %v294_v30 = vmul.f32 %v282_v19, %v231_v16  ;;  %v295_v7 = vmul.f32 %v282_v19, %v232_v9 }
  0xc1   : > { %v308_v62 = vmul.f32 %v287_v1, %v209_v45  ;;  %v309_v55 = vmul.f32 %v287_v1, %v210_v46  ;;  %v306_v49 = vmul.f32 %v282_v19, %v207_v3  ;;  %v307_v4 = vmul.f32 %v282_v19, %v208_v8 }
  0xc2   : > { %v1301_v12 = vsub.f32 %v275_v28, %v296_v38  ;;  %v1303_v22 = vsub.f32 %v276_v60, %v297_v39  ;;  %v1305_v10 = vsub.f32 %v273_v54, %v294_v30  ;;  %v1307_v36 = vsub.f32 %v274_v34, %v295_v7 }
  0xc3   : > { %v1309_v46 = vsub.f32 %v277_v35, %v298_v17  ;;  %v536_v7 = vmul.f32 %v1311_v57, %v1311_v57 }
  0xc4   : > { %v533_v3 = vmul.f32 %v1301_v12, %v1301_v12  ;;  %v534_v0 = vmul.f32 %v1303_v22, %v1303_v22  ;;  %v531_v61 = vmul.f32 %v1305_v10, %v1305_v10  ;;  %v532_v33 = vmul.f32 %v1307_v36, %v1307_v36 }
  0xc5   : > { %v535_v43 = vmul.f32 %v1309_v46, %v1309_v46  ;;  %v548_v60 = vadd.f32 %v542_v42, %v536_v7  ;;  %v1711_v7 = vunpack.c.l.bf16 %v1666_v52 }
  0xc7   : > { %v320_v44 = vpop.permute.xlu1 %319  ;;  %v315_v63 = vpop.permute.xlu0 %314  ;;  %v547_v38 = vadd.f32 %v541_v48, %v535_v43  ;;  %v1707_v43 = vunpack.c.l.bf16 %v1668_v41 }
  0xc8   : > { %v329_v21 = vadd.f32 %v320_v44, %v308_v62  ;;  %v330_v20 = vadd.f32 %v320_v44, %v309_v55  ;;  %v327_v45 = vadd.f32 %v315_v63, %v306_v49  ;;  %v328_v1 = vadd.f32 %v315_v63, %v307_v4 }
  0xc9   : > { %v1359_v62 = vadd.f32 1e-12, %v547_v38  ;;  %v387_v63 = vmul.f32 %v1299_v13, %v1674_v24  ;;  %v1710_v38 = vunpack.c.h.bf16 %v1668_v41 }
  0xca   : > { %v1313_v32 = vadd.f32 %v335_v2, %v329_v21  ;;  %v1315_v8 = vadd.f32 %v336_v56, %v330_v20  ;;  %v1321_v50 = vadd.f32 %v333_v31, %v327_v45  ;;  %v1323_v19 = vadd.f32 %v334_v51, %v328_v1  ;;  %v1351_v31 = vpop.permute.xlu2 %467 }
  0xcb   : > { %v1370_v20 = vadd.f32 1e-12, %v548_v60  ;;  %v388_v45 = vmul.f32 %v1299_v13, %v1673_v25  ;;  %v411_v1 = vmul.f32 %v1299_v13, %v1675_v6  ;;  %vm601_vm14 = vweird.f32 %v1359_v62 }
  0xcc   : > { %v539_v17 = vmul.f32 %v1313_v32, %v1313_v32  ;;  %v540_v15 = vmul.f32 %v1315_v8, %v1315_v8  ;;  %v537_v35 = vmul.f32 %v1321_v50, %v1321_v50  ;;  %v538_v11 = vmul.f32 %v1323_v19, %v1323_v19 }
  0xce   : > { %v545_v16 = vadd.f32 %v539_v17, %v533_v3  ;;  %v546_v9 = vadd.f32 %v540_v15, %v534_v0  ;;  %v543_v53 = vadd.f32 %v537_v35, %v531_v61  ;;  %v544_v29 = vadd.f32 %v538_v11, %v532_v33 }
  0xcf   : > { %v353_v2 = vpop.permute.xlu1 %352  ;;  %v348_v30 = vpop.permute.xlu0 %347  ;;  %v412_v0 = vmul.f32 %v1299_v13, %v1676_v5  ;;  %v1706_v15 = vunpack.c.l.bf16 %v1669_v40 }
  0xd0   : > { %v1345_v39 = vadd.f32 1e-12, %v545_v16  ;;  %v1347_v56 = vadd.f32 1e-12, %v546_v9  ;;  %v1353_v51 = vadd.f32 1e-12, %v543_v53  ;;  %v360_v55 = vmul.f32 %v348_v30, %v1675_v6 }
  0xd1   : > { %v1355_v28 = vadd.f32 1e-12, %v544_v29  ;;  %v362_v54 = vmul.f32 %v353_v2, %v1152_v58  ;;  %v361_v34 = vmul.f32 %v348_v30, %v1676_v5  ;;  %v399_v44 = vmul.f32 %v348_v30, %v1674_v24 }
  0xd2   : > { %905 = vrsqrt.f32 %v1345_v39  ;;  %v363_v49 = vmul.f32 %v353_v2, %v1156_v59  ;;  %v401_v4 = vmul.f32 %v353_v2, %v1672_v26  ;;  %v400_v21 = vmul.f32 %v348_v30, %v1673_v25 }
  0xd3   : > { %907 = vrsqrt.f32 %v1347_v56  ;;  %v402_v17 = vmul.f32 %v353_v2, %v1671_v27  ;;  %v366_v61 = vadd.f32 %v360_v55, %v1706_v15  ;;  %v368_v16 = vadd.f32 %v362_v54, %v1707_v43 }
  0xd4   : > { %909 = vrsqrt.f32 %v1353_v51  ;;  %v1708_v9 = vunpack.c.h.bf16 %v1669_v40  ;;  %v1709_v53 = vunpack.c.l.bf16 %v1667_v47  ;;  %v369_v30 = vadd.f32 %v363_v49, %v1710_v38 }
  0xd5   : > { %911 = vrsqrt.f32 %v1355_v28  ;;  %v407_v60 = vadd.f32 %v401_v4, %v1711_v7  ;;  %v1712_v55 = vunpack.c.h.bf16 %v1667_v47  ;;  %vm581_vm0 = vweird.f32 %v1345_v39 }
  0xd6   : > { %913 = vrsqrt.f32 %v1359_v62  ;;  %v367_v42 = vadd.f32 %v361_v34, %v1708_v9  ;;  %v405_v13 = vadd.f32 %v399_v44, %v1709_v53  ;;  %v473_v34 = vpop.permute.xlu2 %472  ;;  %vm591_vm1 = vweird.f32 %v1347_v56 }
  0xd7   : > { %v1378_v48 = vpop.permute.xlu1 %425  ;;  %v380_v33 = vpop.permute.xlu0 %379  ;;  %v406_v54 = vadd.f32 %v400_v21, %v1712_v55  ;;  %v393_v21 = vsub.f32 %v366_v61, %v387_v63  ;;  %v1713_v55 = vunpack.c.h.bf16 %v1666_v52  ;;  %915 = vrsqrt.f32 %v1370_v20 }
  0xd8   : > { %v1380_v3 = vpop.eup %905  ;;  %v389_v9 = vmul.f32 %v380_v33, %v1672_v26  ;;  %v390_v53 = vmul.f32 %v380_v33, %v1671_v27  ;;  %v413_v38 = vmul.f32 %v380_v33, %v1152_v58  ;;  %v394_v5 = vsub.f32 %v367_v42, %v388_v45 }
  0xd9   : > { %v1388_v35 = vpop.eup %907  ;;  %v576_v11 = vmul.f32 %v1380_v3, %v1345_v39  ;;  %v417_v6 = vadd.f32 %v411_v1, %v405_v13  ;;  %v438_v27 = vmul.f32 %v1378_v48, %v393_v21  ;;  %v418_v40 = vadd.f32 %v412_v0, %v406_v54 }
  0xda   : > { %v1398_v29 = vpop.eup %909  ;;  %v586_v2 = vmul.f32 %v1388_v35, %v1347_v56  ;;  %v439_v63 = vmul.f32 %v1378_v48, %v394_v5  ;;  %v395_v61 = vsub.f32 %v368_v16, %v389_v9  ;;  %v419_v45 = vadd.f32 %v413_v38, %v407_v60 }
  0xdb   : > { %v1408_v15 = vpop.eup %911  ;;  %v577_v43 = vmul.f32 %v1380_v3, %v576_v11  ;;  %v556_v44 = vmul.f32 %v1398_v29, %v1353_v51  ;;  %v408_v11 = vadd.f32 %v402_v17, %v1713_v55  ;;  %v481_v16 = vmul.f32 %v1351_v31, %v418_v40 }
  0xdc   : > { %v587_v49 = vmul.f32 %v1388_v35, %v586_v2  ;;  %v566_v4 = vmul.f32 %v1408_v15, %v1355_v28  ;;  %v1422_v24 = vpop.eup %913  ;;  %v414_v2 = vmul.f32 %v380_v33, %v1156_v59  ;;  %v494_v9 = vmul.f32 %v473_v34, %v395_v61 }
  0xdd   : > { %v557_v7 = vmul.f32 %v1398_v29, %v556_v44  ;;  %v578_v25 = vmul.f32 0.5, %v577_v43  ;;  %v396_v44 = vsub.f32 %v369_v30, %v390_v53  ;;  %v480_v43 = vmul.f32 %v1351_v31, %v417_v6 }
  0xde   : > { %v567_v26 = vmul.f32 %v1408_v15, %v566_v4  ;;  %v588_v41 = vmul.f32 0.5, %v587_v49  ;;  %v1431_v33 = vmul.f32 %v1422_v24, %v1359_v62  ;;  %v420_v54 = vadd.f32 %v414_v2, %v408_v11  ;;  %v506_v4 = vpop.permute.xlu2 %505 }
  0xdf   : > { %v447_v37 = vpop.permute.xlu1 %446  ;;  %v558_v47 = vmul.f32 0.5, %v557_v7  ;;  %v431_v1 = vpop.permute.xlu0 %430  ;;  %v579_v0 = vsub.f32 1.5, %v578_v25  ;;  %v495_v53 = vmul.f32 %v473_v34, %v396_v44  ;;  %v482_v60 = vmul.f32 %v473_v34, %v419_v45 }
  0xe0   : > { %v459_v17 = vadd.f32 %v447_v37, %v438_v27  ;;  %v568_v42 = vmul.f32 0.5, %v567_v26  ;;  %v460_v13 = vadd.f32 %v447_v37, %v439_v63  ;;  %v589_v27 = vsub.f32 1.5, %v588_v41 }
  0xe1   : > { %v559_v26 = vsub.f32 1.5, %v558_v47  ;;  %v521_v37 = vmul.f32 %v431_v1, %v419_v45  ;;  %v522_v7 = vmul.f32 %v431_v1, %v420_v54  ;;  %v440_v55 = vmul.f32 %v431_v1, %v395_v61  ;;  %v1441_v47 = vpop.eup %915 }
  0xe2   : > { %v486_v30 = vsub.f32 %v459_v17, %v480_v43  ;;  %v569_v49 = vsub.f32 1.5, %v568_v42  ;;  %v487_v38 = vsub.f32 %v460_v13, %v481_v16  ;;  %v441_v25 = vmul.f32 %v431_v1, %v396_v44 }
  0xe3   : > { %v483_v11 = vmul.f32 %v473_v34, %v420_v54  ;;  %v515_v2 = vadd.f32 %v506_v4, %v494_v9  ;;  %v580_v63 = vmul.f32 %v1380_v3, %v579_v0  ;;  %v516_v52 = vadd.f32 %v506_v4, %v495_v53 }
  0xe4   : > { %v615_v17 = vmul.f32 %v486_v30, %v1305_v10  ;;  %vm582_vm2 = vweird.f32 %v1380_v3  ;;  %v492_v41 = vmul.f32 %v1351_v31, %v393_v21  ;;  %v493_v61 = vmul.f32 %v1351_v31, %v394_v5 }
  0xe5   : > { %v527_v13 = vadd.f32 %v521_v37, %v515_v2  ;;  %v528_v34 = vadd.f32 %v522_v7, %v516_v52  ;;  %v590_v1 = vmul.f32 %v1388_v35, %v589_v27  ;;  %v519_v0 = vmul.f32 %v1378_v48, %v417_v6  ;;  %vm1457_vm5 = vmor %vm581_vm0, %vm582_vm2 }
  0xe6   : > { %v520_v30 = vmul.f32 %v1378_v48, %v418_v40  ;;  %vm592_vm3 = vweird.f32 %v1388_v35  ;;  %v560_v21 = vmul.f32 %v1398_v29, %v559_v26  ;;  %vm562_vm4 = vweird.f32 %v1398_v29 }
  0xe7   : > { %v452_v43 = vpop.permute.xlu1 %451  ;;  %v501_v44 = vpop.permute.xlu0 %500  ;;  %v623_v31 = vmul.f32 %v527_v13, %v1313_v32  ;;  %v624_v48 = vmul.f32 %v528_v34, %v1315_v8  ;;  %v570_v27 = vmul.f32 %v1408_v15, %v569_v49  ;;  %vm572_vm6 = vweird.f32 %v1408_v15  ;;  %vm1471_vm8 = vmor %vm591_vm1, %vm592_vm3  ;;  %v1722_v13 = vld [vmem:[#allocation36_spill] sm:$0xff] }
  0xe8   : > { %v461_v45 = vadd.f32 %v452_v43, %v440_v55  ;;  %v462_v42 = vadd.f32 %v452_v43, %v441_v25  ;;  %v513_v10 = vadd.f32 %v501_v44, %v492_v41  ;;  %v514_v9 = vadd.f32 %v501_v44, %v493_v61  ;;  %v1718_v55 = vld [vmem:[#allocation31_spill] sm:$0xff]  ;;  %v1723_v44 = vld [vmem:[#allocation37_spill] sm:$0xff]  ;;  %v1724_v32 = vld [vmem:[#allocation28_spill] sm:$0xff] }
  0xe9   : > { %vm561_vm7 = vweird.f32 %v1353_v51  ;;  %vm571_vm9 = vweird.f32 %v1355_v28  ;;  %v606_v56 = vmul.f32 %v1441_v47, %v1370_v20  ;;  %v594_v28 = vsel %vm1471_vm8, %v1388_v35, %v590_v1 }
  0xea   : > { %v488_v54 = vsub.f32 %v461_v45, %v482_v60  ;;  %v489_v16 = vsub.f32 %v462_v42, %v483_v11  ;;  %v525_v53 = vadd.f32 %v519_v0, %v513_v10  ;;  %v526_v6 = vadd.f32 %v520_v30, %v514_v9  ;;  %vm563_vm10 = vmor %vm561_vm7, %vm562_vm4 }
  0xeb   : > { %v564_v51 = vsel %vm563_vm10, %v1398_v29, %v560_v21  ;;  %vm573_vm11 = vmor %vm571_vm9, %vm572_vm6  ;;  %v607_v2 = vmul.f32 %v1441_v47, %v606_v56  ;;  %vm602_vm12 = vweird.f32 %v1422_v24  ;;  %vm612_vm13 = vweird.f32 %v1441_v47 }
  0xec   : > { %v617_v5 = vmul.f32 %v488_v54, %v1301_v12  ;;  %v618_v52 = vmul.f32 %v489_v16, %v1303_v22  ;;  %v621_v12 = vmul.f32 %v525_v53, %v1321_v50  ;;  %v616_v22 = vmul.f32 %v487_v38, %v1307_v36  ;;  %v436_v53 = vpop.permute.xlu2 %435  ;;  %vm603_vm15 = vmor %vm601_vm14, %vm602_vm12 }
  0xed   : > { %v622_v8 = vmul.f32 %v526_v6, %v1323_v19  ;;  %v597_v36 = vmul.f32 %v1422_v24, %v1431_v33  ;;  %v584_v19 = vsel %vm1457_vm5, %v1380_v3, %v580_v63  ;;  %v574_v49 = vsel %vm573_vm11, %v1408_v15, %v570_v27  ;;  %v1719_v15 = vld [vmem:[#allocation21_spill] sm:$0xff] }
  0xee   : > { %v629_v39 = vadd.f32 %v623_v31, %v617_v5  ;;  %v630_v26 = vadd.f32 %v624_v48, %v618_v52  ;;  %v627_v50 = vadd.f32 %v621_v12, %v615_v17  ;;  %v1720_v63 = vunpack.c.l.bf16 %v1719_v15 }
  0xef   : > { %v628_v37 = vadd.f32 %v622_v8, %v616_v22  ;;  %v358_v60 = vpop.permute.xlu0 %357  ;;  %v385_v29 = vpop.permute.xlu1 %384  ;;  %v1721_v43 = vunpack.c.h.bf16 %v1719_v15  ;;  %v598_v45 = vmul.f32 0.5, %v597_v36  ;;  %v608_v40 = vmul.f32 0.5, %v607_v2 }
  0xf0   : > { %v1491_v4 = vmul.f32 %v627_v50, %v564_v51  ;;  %v1493_v33 = vmul.f32 %v629_v39, %v584_v19  ;;  %v364_v7 = vmul.f32 %v358_v60, %v1160_v14  ;;  %v365_v25 = vmul.f32 %v358_v60, %v1718_v55 }
  0xf1   : > { %v1495_v38 = vmul.f32 %v628_v37, %v574_v49  ;;  %v1499_v11 = vmul.f32 %v630_v26, %v594_v28  ;;  %v391_v61 = vmul.f32 %v385_v29, %v1722_v13  ;;  %v392_v34 = vmul.f32 %v385_v29, %v1723_v44 }
  0xf2   : > { %v645_v3 = vrot.slane %v1491_v4, 6  ;;  %v370_v17 = vadd.f32 %v364_v7, %v1720_v63  ;;  %v371_v41 = vadd.f32 %v365_v25, %v1721_v43  ;;  %v639_v1 = vadd.f32 0.5, %v1491_v4 }
  0xf3   : > { %v646_v35 = vrot.slane %v1495_v38, 6  ;;  %v403_v10 = vmul.f32 %v358_v60, %v1722_v13  ;;  %v653_v54 = vrot.slane %v1493_v33, 6  ;;  %v404_v30 = vmul.f32 %v358_v60, %v1723_v44 }
  0xf4   : > { %v649_v42 = vsub.f32 %v1491_v4, %v645_v3  ;;  %v397_v9 = vsub.f32 %v370_v17, %v391_v61  ;;  %v654_v21 = vrot.slane %v1499_v11, 6  ;;  %v640_v5 = vadd.f32 0.5, %v1495_v38 }
  0xf5   : > { %v650_v0 = vsub.f32 %v1495_v38, %v646_v35  ;;  %v398_v31 = vsub.f32 %v371_v41, %v392_v34  ;;  %v657_v6 = vsub.f32 %v1493_v33, %v653_v54  ;;  %v599_v12 = vsub.f32 1.5, %v598_v45 }
  0xf6   : > { %v661_v16 = vrot.slane %v649_v42, 6  ;;  %v658_v27 = vsub.f32 %v1499_v11, %v654_v21  ;;  %v1725_v39 = vunpack.c.l.bf16 %v1724_v32  ;;  %v1726_v26 = vunpack.c.h.bf16 %v1724_v32 }
  0xf7   : > { %v662_v52 = vrot.slane %v650_v0, 6  ;;  %v442_v36 = vmul.f32 %v436_v53, %v397_v9  ;;  %v677_v56 = vrot.slane %v657_v6, 6  ;;  %v457_v51 = vpop.permute.xlu1 %456  ;;  %v443_v37 = vmul.f32 %v436_v53, %v398_v31  ;;  %v478_v43 = vpop.permute.xlu0 %477 }
  0xf8   : > { %v665_v48 = vmul.f32 %v661_v16, %v639_v1  ;;  %v409_v8 = vadd.f32 %v403_v10, %v1725_v39  ;;  %v410_v50 = vadd.f32 %v404_v30, %v1726_v26  ;;  %v678_v19 = vrot.slane %v658_v27, 6 }
  0xf9   : > { %v666_v22 = vmul.f32 %v662_v52, %v640_v5  ;;  %v691_v28 = vmul.f32 %v657_v6, %v639_v1  ;;  %v609_v49 = vsub.f32 1.5, %v608_v40  ;;  %v415_v7 = vmul.f32 %v385_v29, %v1160_v14 }
  0xfa   : > { %v669_v60 = vrot.slane %v665_v48, 4  ;;  %v416_v25 = vmul.f32 %v385_v29, %v1718_v55  ;;  %v701_v3 = vrot.slane %v649_v42, 4  ;;  %v600_v2 = vmul.f32 %v1422_v24, %v599_v12 }
  0xfb   : > { %v670_v35 = vrot.slane %v666_v22, 4  ;;  %v692_v63 = vmul.f32 %v658_v27, %v640_v5  ;;  %v702_v17 = vrot.slane %v650_v0, 4  ;;  %v463_v41 = vadd.f32 %v457_v51, %v442_v36  ;;  %v511_v0 = vpop.permute.xlu2 %510 }
  0xfc   : > { %v421_v45 = vadd.f32 %v415_v7, %v409_v8  ;;  %v422_v61 = vadd.f32 %v416_v25, %v410_v50  ;;  %v681_v34 = vmul.f32 %v677_v56, %v1493_v33  ;;  %v464_v1 = vadd.f32 %v457_v51, %v443_v37 }
  0xfd   : > { %v673_v10 = vadd.f32 %v669_v60, %v1491_v4  ;;  %v682_v29 = vmul.f32 %v678_v19, %v1499_v11  ;;  %v695_v42 = vrot.slane %v691_v28, 2  ;;  %v705_v54 = vmul.f32 %v701_v3, %v1493_v33 }
  0xfe   : > { %v484_v16 = vmul.f32 %v478_v43, %v421_v45  ;;  %v485_v30 = vmul.f32 %v478_v43, %v422_v61  ;;  %v496_v21 = vmul.f32 %v478_v43, %v397_v9  ;;  %v674_v5 = vadd.f32 %v670_v35, %v1495_v38 }
  0xff   : > { %v696_v52 = vrot.slane %v692_v63, 2  ;;  %v706_v6 = vmul.f32 %v702_v17, %v1499_v11  ;;  %v497_v40 = vmul.f32 %v478_v43, %v398_v31  ;;  %v523_v48 = vmul.f32 %v436_v53, %v421_v45 }
 0x100   : > { %v685_v27 = vrot.slane %v681_v34, 6  ;;  %v490_v12 = vsub.f32 %v463_v41, %v484_v16  ;;  %v517_v22 = vadd.f32 %v511_v0, %v496_v21  ;;  %v524_v39 = vmul.f32 %v436_v53, %v422_v61 }
 0x101   : > { %v686_v8 = vrot.slane %v682_v29, 6  ;;  %v491_v26 = vsub.f32 %v464_v1, %v485_v30  ;;  %v518_v50 = vadd.f32 %v511_v0, %v497_v40  ;;  %v699_v56 = vadd.f32 %v695_v42, %v1493_v33 }
 0x102   : > { %v689_v36 = vsub.f32 %v673_v10, %v685_v27  ;;  %v709_v51 = vrot.slane %v705_v54, 4  ;;  %v529_v9 = vadd.f32 %v523_v48, %v517_v22  ;;  %v700_v60 = vadd.f32 %v696_v52, %v1499_v11 }
 0x103   : > { %v690_v37 = vsub.f32 %v674_v5, %v686_v8  ;;  %v710_v19 = vrot.slane %v706_v6, 4  ;;  %v530_v28 = vadd.f32 %v524_v39, %v518_v50  ;;  %v610_v31 = vmul.f32 %v1441_v47, %v609_v49 }
 0x104   : > { %v641_v7 = vadd.f32 1.0, %v1493_v33  ;;  %v619_v25 = vmul.f32 %v490_v12, %v1309_v46  ;;  %v625_v53 = vmul.f32 %v529_v9, %v1294_v18  ;;  %v642_v3 = vadd.f32 1.0, %v1499_v11 }
 0x105   : > { %v620_v35 = vmul.f32 %v491_v26, %v1311_v57  ;;  %v626_v63 = vmul.f32 %v530_v28, %v1317_v23  ;;  %vm611_vm0 = vweird.f32 %v1370_v20  ;;  %v713_v49 = vadd.f32 %v709_v51, %v699_v56 }
 0x106   : > { %v715_v17 = vmul.f32 %v689_v36, %v641_v7  ;;  %v631_v33 = vadd.f32 %v625_v53, %v619_v25  ;;  %vm613_vm1 = vmor %vm611_vm0, %vm612_vm13  ;;  %v604_v18 = vsel %vm603_vm15, %v1422_v24, %v600_v2  ;;  %v714_v46 = vadd.f32 %v710_v19, %v700_v60 }
 0x107   : > { %v716_v62 = vmul.f32 %v690_v37, %v642_v3  ;;  %v632_v11 = vadd.f32 %v626_v63, %v620_v35  ;;  %v614_v57 = vsel %vm613_vm1, %v1441_v47, %v610_v31  ;;  %v747_v43 = vrot.slane %v641_v7, 6 }
 0x108   : > { %v637_v23 = vmul.f32 %v631_v33, %v604_v18  ;;  %v748_v41 = vrot.slane %v642_v3, 6  ;;  %v719_v61 = vrot.slane %v715_v17, 2 }
 0x109   : > { %v638_v45 = vmul.f32 %v632_v11, %v614_v57  ;;  %v751_v34 = vmul.f32 %v747_v43, %v713_v49  ;;  %v720_v10 = vrot.slane %v716_v62, 2 }
 0x10a   : > { %v725_v20 = vmul.f32 %v713_v49, %v637_v23  ;;  %v737_v1 = vrot.slane %v637_v23, 2  ;;  %v752_v29 = vmul.f32 %v748_v41, %v714_v46  ;;  %v723_v21 = vadd.f32 %v719_v61, %v1491_v4 }
 0x10b   : > { %v726_v42 = vmul.f32 %v714_v46, %v638_v45  ;;  %v738_v54 = vrot.slane %v638_v45, 2  ;;  %v755_v0 = vrot.slane %v751_v34, 2  ;;  %v724_v5 = vadd.f32 %v720_v10, %v1495_v38 }
 0x10c   : > { %v729_v16 = vrot.slane %v725_v20, 4  ;;  %v741_v30 = vmul.f32 %v737_v1, %v689_v36  ;;  %v756_v52 = vrot.slane %v752_v29, 2 }
 0x10d   : > { %v730_v24 = vrot.slane %v726_v42, 4  ;;  %v742_v2 = vmul.f32 %v738_v54, %v690_v37  ;;  %v836_v42 = vlaneseq }
 0x10e   : > { %v743_v47 = vadd.f32 %v741_v30, %v637_v23  ;;  %v733_v40 = vsub.f32 %v723_v21, %v729_v16 }
 0x10f   : > { %v744_v6 = vadd.f32 %v742_v2, %v638_v45  ;;  %v734_v27 = vsub.f32 %v724_v5, %v730_v24  ;;  %vm838_vm8 = vcmp.lt.s32.totalorder %v836_v42, 256 }
 0x110   : > { %v759_v48 = vadd.f32 %v755_v0, %v743_v47  ;;  %v761_v8 = vmul.f32 %v733_v40, %v733_v40  ;;  %v797_v49 = vrot.slane %v733_v40, 7 }
 0x111   : > { %v760_v12 = vadd.f32 %v756_v52, %v744_v6  ;;  %v762_v50 = vmul.f32 %v734_v27, %v734_v27  ;;  %v798_v33 = vrot.slane %v734_v27, 7 }
 0x112   : > { %v763_v22 = vmul.f32 %v759_v48, %v759_v48  ;;  %v805_v38 = vrot.slane %v759_v48, 7  ;;  %v801_v43 = vmul.f32 %v797_v49, %v733_v40 }
 0x113   : > { %v764_v39 = vmul.f32 %v760_v12, %v760_v12  ;;  %v806_v28 = vrot.slane %v760_v12, 7  ;;  %v802_v41 = vmul.f32 %v798_v33, %v734_v27 }
 0x114   : > { %v767_v26 = vrot.slane %v763_v22, 2  ;;  %v809_v53 = vmul.f32 %v805_v38, %v759_v48 }
 0x115   : > { %v768_v36 = vrot.slane %v764_v39, 2  ;;  %v810_v35 = vmul.f32 %v806_v28, %v760_v12 }
 0x116   : > { %v771_v56 = vadd.f32 %v767_v26, %v761_v8  ;;  %v813_v46 = vrot.slane %v809_v53, 2 }
 0x117   : > { %v772_v51 = vadd.f32 %v768_v36, %v762_v50  ;;  %v814_v11 = vrot.slane %v810_v35, 2 }
 0x118   : > { %v773_v9 = vadd.f32 1e-12, %v771_v56  ;;  %v817_v61 = vadd.f32 %v813_v46, %v801_v43 }
 0x119   : > { %v774_v4 = vadd.f32 1e-12, %v772_v51  ;;  %v818_v20 = vadd.f32 %v814_v11, %v802_v41 }
 0x11a   : > { %917 = vrsqrt.f32 %v773_v9  ;;  %vm781_vm4 = vweird.f32 %v773_v9 }
 0x11b   : > { %919 = vrsqrt.f32 %v774_v4  ;;  %vm791_vm6 = vweird.f32 %v774_v4 }
 0x120   : > { %v918_v37 = vpop.eup %917 }
 0x121   : > { %v920_v60 = vpop.eup %919  ;;  %v776_v19 = vmul.f32 %v918_v37, %v773_v9  ;;  %vm782_vm2 = vweird.f32 %v918_v37 }
 0x122   : > { %v786_v31 = vmul.f32 %v920_v60, %v774_v4  ;;  %vm792_vm3 = vweird.f32 %v920_v60  ;;  %vm783_vm5 = vmor %vm781_vm4, %vm782_vm2 }
 0x123   : > { %v777_v7 = vmul.f32 %v918_v37, %v776_v19  ;;  %vm793_vm7 = vmor %vm791_vm6, %vm792_vm3 }
 0x124   : > { %v787_v25 = vmul.f32 %v920_v60, %v786_v31 }
 0x125   : > { %v778_v3 = vmul.f32 0.5, %v777_v7 }
 0x126   : > { %v788_v63 = vmul.f32 0.5, %v787_v25 }
 0x127   : > { %v779_v17 = vsub.f32 1.5, %v778_v3 }
 0x128   : > { %v789_v18 = vsub.f32 1.5, %v788_v63 }
 0x129   : > { %v780_v62 = vmul.f32 %v918_v37, %v779_v17 }
 0x12a   : > { %v790_v57 = vmul.f32 %v920_v60, %v789_v18 }
 0x12b   : > { %v784_v23 = vsel %vm783_vm5, %v918_v37, %v780_v62 }
 0x12c   : > { %v794_v45 = vsel %vm793_vm7, %v920_v60, %v790_v57  ;;  %v821_v34 = vrot.slane %v784_v23, 7 }
 0x12d   : > { %v822_v1 = vrot.slane %v794_v45, 7 }
 0x12e   : > { %v825_v10 = vmul.f32 %v821_v34, %v817_v61 }
 0x12f   : > { %v826_v29 = vmul.f32 %v822_v1, %v818_v20 }
 0x130   : > { %829 = vst [vmem:[#allocation1] sm:$0xff] %v825_v10 }
 0x131   : > { %830 = vst [vmem:[#allocation1 + $0x9] sm:$0xff] %v826_v29 }
 0x135   :  { %119 = sbr.rel (!%p117_p0) target bundleno = 35 (0x23), region = 45 }
 0x138   : > { %v832_v54 = vld [vmem:[#allocation1 + $0x7] ss:$9 sm:$0xff] }
 0x139   : > { %840 = vst.msk [vmem:[%s835_s6] sm:$0x3] %vm838_vm8, %v832_v54 }
 0x13a   :  { %853 = dma.vmem_to_hbm [thread:$0]  %s846_s11, 64, %s848_s9, [#allocation3], %s957_s12, %s957_s12, %s958_s13  }
 0x13b   :  { %949 = dma.done.wait [#allocation3], 64  }
 0x13c   :  { %950 = vsyncadd [#allocation3], 4294967232 }
 0x13d   :  { %858 = vsyncpa [#allocation3], 1 }

</bundles_post_ra>
